<compile_context>
chip_gen: v7x
topology: tpu7x:2x2x1
jax: 0.10.0
libtpu: 0.0.40
codegen_flags: <defaults>
</compile_context>

<pallas_src>
import functools

import jax
import jax.numpy as jnp
from jax import lax
from jax.experimental import pallas as pl
from jax.experimental.pallas import tpu as pltpu


VMEM_LIMIT = 48 * 1024 * 1024  # safe on v5e/v6e/v7x, above default scoped limits


def _pick_tile(n, max_tile=512):
    t = max_tile
    while t > 128 and n % t:
        t //= 2
    return min(t, n)


def _head_major_perm(d_model, h):
    # new channel c' = head*dim + d  <-  old channel c = d*h + head
    dim = d_model // h
    return jnp.arange(d_model).reshape(dim, h).T.reshape(-1)


def _pad_n(x, n_pad):
    n = x.shape[-1]
    if n == n_pad:
        return x
    return jnp.pad(x, ((0, 0), (0, 0), (0, n_pad - n)))


# ---------------------------------------------------------------------------
# Fused Q/K/V projection: three 1x1 convs in one pallas_call, N-tiled.
# ---------------------------------------------------------------------------
def _qkv_proj_kernel(xq_ref, xk_ref, xv_ref, w_ref, b_ref,
                     oq_ref, ok_ref, ov_ref):
    for i, (x_ref, o_ref) in enumerate(
            ((xq_ref, oq_ref), (xk_ref, ok_ref), (xv_ref, ov_ref))):
        x = x_ref[0].astype(jnp.bfloat16)          # (Cin, TN)
        w = w_ref[i]                               # (Cout, Cin) bf16
        y = lax.dot_general(w, x, (((1,), (0,)), ((), ())),
                            preferred_element_type=jnp.float32)  # (Cout, TN)
        o_ref[0] = (y + b_ref[i]).astype(o_ref.dtype)


def qkv_project(xq, xk, xv, w_qkv, b_qkv, out_dtype):
    B, c_in, n = xq.shape
    c_out = w_qkv.shape[1]
    tn = _pick_tile(n)
    x_spec = pl.BlockSpec((1, c_in, tn), lambda b, t: (b, 0, t))
    o_spec = pl.BlockSpec((1, c_out, tn), lambda b, t: (b, 0, t))
    w_spec = pl.BlockSpec((3, c_out, c_in), lambda b, t: (0, 0, 0))
    b_spec = pl.BlockSpec((3, c_out, 1), lambda b, t: (0, 0, 0))
    out_sh = jax.ShapeDtypeStruct((B, c_out, n), out_dtype)
    return pl.pallas_call(
        _qkv_proj_kernel,
        out_shape=(out_sh, out_sh, out_sh),
        grid=(B, n // tn),
        in_specs=[x_spec, x_spec, x_spec, w_spec, b_spec],
        out_specs=(o_spec, o_spec, o_spec),
        compiler_params=pltpu.CompilerParams(
            dimension_semantics=("parallel", "parallel"),
            vmem_limit_bytes=VMEM_LIMIT),
    )(xq, xk, xv, w_qkv, b_qkv)


# ---------------------------------------------------------------------------
# Single 1x1 conv (merge projection), N-tiled.
# ---------------------------------------------------------------------------
def _conv1x1_kernel(x_ref, w_ref, b_ref, o_ref):
    x = x_ref[0].astype(jnp.bfloat16)              # (Cin, TN)
    y = lax.dot_general(w_ref[...], x, (((1,), (0,)), ((), ())),
                        preferred_element_type=jnp.float32)
    o_ref[0] = (y + b_ref[...]).astype(o_ref.dtype)


def conv1x1(x, w, b, out_dtype):
    B, c_in, n = x.shape
    c_out = w.shape[0]
    tn = _pick_tile(n)
    return pl.pallas_call(
        _conv1x1_kernel,
        out_shape=jax.ShapeDtypeStruct((B, c_out, n), out_dtype),
        grid=(B, n // tn),
        in_specs=[pl.BlockSpec((1, c_in, tn), lambda i, t: (i, 0, t)),
                  pl.BlockSpec((c_out, c_in), lambda i, t: (0, 0)),
                  pl.BlockSpec((c_out, 1), lambda i, t: (0, 0))],
        out_specs=pl.BlockSpec((1, c_out, tn), lambda i, t: (i, 0, t)),
        compiler_params=pltpu.CompilerParams(
            dimension_semantics=("parallel", "parallel"),
            vmem_limit_bytes=VMEM_LIMIT),
    )(x, w, b)


# ---------------------------------------------------------------------------
# Scaled dot-product attention, gridded over (batch, head, query-tile).
# Scale is pre-folded into the q projection; softmax runs in f32.
# ---------------------------------------------------------------------------
def _attention_kernel(q_ref, k_ref, v_ref, o_ref, *, n_valid, n_kv):
    q = q_ref[0, 0]                                # (D, TQ)  bf16
    k = k_ref[0, 0]                                # (D, Nkv) bf16
    v = v_ref[0, 0]                                # (D, Nkv) bf16
    # scores[n, m] = sum_d q[d, n] k[d, m]  (contract shared axis, no .T)
    scores = lax.dot_general(q, k, (((0,), (0,)), ((), ())),
                             preferred_element_type=jnp.float32)  # (TQ, Nkv)
    if n_valid < n_kv:                             # mask zero-padded keys
        col = lax.broadcasted_iota(jnp.int32, scores.shape, 1)
        scores = jnp.where(col < n_valid, scores, -1e30)
    m = jnp.max(scores, axis=-1, keepdims=True)
    e = jnp.exp(scores - m)
    denom = jnp.sum(e, axis=-1, keepdims=True)
    prob = (e * pl.reciprocal(denom, approx=True)).astype(v.dtype)
    # out[d, n] = sum_m v[d, m] prob[n, m]
    out = lax.dot_general(v, prob, (((1,), (1,)), ((), ())),
                          preferred_element_type=jnp.float32)     # (D, TQ)
    o_ref[0, 0] = out.astype(o_ref.dtype)


def attention_pallas(q, k, v, n_valid):
    # q, k, v: (B, H, D, Npad)
    B, H, D, n = q.shape
    tq = 256 if n % 256 == 0 else 128
    kern = functools.partial(_attention_kernel, n_valid=n_valid, n_kv=n)
    qo_spec = pl.BlockSpec((1, 1, D, tq), lambda b, hd, t: (b, hd, 0, t))
    kv_spec = pl.BlockSpec((1, 1, D, n), lambda b, hd, t: (b, hd, 0, 0))
    return pl.pallas_call(
        kern,
        out_shape=jax.ShapeDtypeStruct((B, H, D, n), q.dtype),
        grid=(B, H, n // tq),
        in_specs=[qo_spec, kv_spec, kv_spec],
        out_specs=qo_spec,
        compiler_params=pltpu.CompilerParams(
            dimension_semantics=("parallel", "parallel", "parallel"),
            vmem_limit_bytes=VMEM_LIMIT),
    )(q, k, v)


# ---------------------------------------------------------------------------
# MultiHeadedAttention forward (matches the PyTorch module semantics).
# ---------------------------------------------------------------------------
def multi_headed_attention(params, query, key, value, h):
    B, d_model, N = query.shape
    dim = d_model // h
    n_pad = ((N + 127) // 128) * 128
    perm = _head_major_perm(d_model, h)

    # Fold head-split permutation (and 1/sqrt(dim) for q) into the weights.
    inv_scale = 1.0 / (dim ** 0.5)
    wq = params["proj_w"][0][perm, :] * inv_scale
    bq = params["proj_b"][0][perm, :] * inv_scale
    wk = params["proj_w"][1][perm, :]
    bk = params["proj_b"][1][perm, :]
    wv = params["proj_w"][2][perm, :]
    bv = params["proj_b"][2][perm, :]
    w_qkv = jnp.stack([wq, wk, wv]).astype(jnp.bfloat16)   # (3, d_model, d_model)
    b_qkv = jnp.stack([bq, bk, bv])                        # (3, d_model, 1) f32
    w_merge = params["merge_w"][:, perm].astype(jnp.bfloat16)
    b_merge = params["merge_b"]

    xq = _pad_n(query, n_pad)
    xk = _pad_n(key, n_pad)
    xv = _pad_n(value, n_pad)

    q, k, v = qkv_project(xq, xk, xv, w_qkv, b_qkv, out_dtype=jnp.bfloat16)
    q = q.reshape(B, h, dim, n_pad)          # head-major channels: pure reshape
    k = k.reshape(B, h, dim, n_pad)
    v = v.reshape(B, h, dim, n_pad)

    x = attention_pallas(q, k, v, n_valid=N)                 # (B, h, dim, n_pad)
    x = x.reshape(B, d_model, n_pad)                         # pure reshape

    out = conv1x1(x, w_merge, b_merge, out_dtype=query.dtype)
    return out[..., :N]


# ---------------------------------------------------------------------------
# Pure-JAX f32 reference (mirrors the PyTorch einsums) for correctness check.
# ---------------------------------------------------------------------------
def reference(params, query, key, value, h):
    B, d_model, N = query.shape
    dim = d_model // h

    def conv(x, w, b):
        return jnp.einsum("oc,bcn->bon", w, x) + b.reshape(1, -1, 1)

    q = conv(query, params["proj_w"][0], params["proj_b"][0]).reshape(B, dim, h, N)
    k = conv(key, params["proj_w"][1], params["proj_b"][1]).reshape(B, dim, h, N)
    v = conv(value, params["proj_w"][2], params["proj_b"][2]).reshape(B, dim, h, N)
    scores = jnp.einsum("bdhn,bdhm->bhnm", q, k) / (dim ** 0.5)
    prob = jax.nn.softmax(scores, axis=-1)
    x = jnp.einsum("bhnm,bdhm->bdhn", prob, v)
    return conv(x.reshape(B, d_model, N), params["merge_w"], params["merge_b"])


if __name__ == "__main__":
    h, d_model, B, N = 4, 32, 2, 16

    root = jax.random.PRNGKey(0)
    keys = jax.random.split(root, 12)

    # Deterministic synthetic parameters (shapes match nn.Conv1d(d_model, d_model, 1)).
    scale = 1.0 / (d_model ** 0.5)
    proj_w = [scale * jax.random.normal(keys[i], (d_model, d_model), jnp.float32)
              for i in range(3)]
    proj_b = [0.1 * jax.random.normal(keys[3 + i], (d_model, 1), jnp.float32)
              for i in range(3)]
    merge_w = scale * jax.random.normal(keys[6], (d_model, d_model), jnp.float32)
    merge_b = 0.1 * jax.random.normal(keys[7], (d_model, 1), jnp.float32)
    params = {"proj_w": proj_w, "proj_b": proj_b,
              "merge_w": merge_w, "merge_b": merge_b}

    query = jax.random.normal(keys[8], (B, d_model, N), jnp.float32)
    key = jax.random.normal(keys[9], (B, d_model, N), jnp.float32)
    value = jax.random.normal(keys[10], (B, d_model, N), jnp.float32)

    fwd = jax.jit(multi_headed_attention, static_argnums=(4,))
    out = fwd(params, query, key, value, h)
    out = jax.block_until_ready(out)

    ref = reference(params, query, key, value, h)
    assert out.shape == (B, d_model, N)
    max_err = float(jnp.max(jnp.abs(out - ref)))
    assert jnp.allclose(out, ref, atol=5e-2, rtol=5e-2), \
        f"mismatch vs reference (max abs err {max_err})"

    print("KERNEL_OK")
</pallas_src>

<mosaic_0001>
module attributes {stable_mosaic.version = 11 : i64} {
  func.func @_attention_kernel(%arg0: i32, %arg1: i32, %arg2: i32, %arg3: memref<1x1x8x128xbf16, #tpu.memory_space<vmem>>, %arg4: memref<1x1x8x128xbf16, #tpu.memory_space<vmem>>, %arg5: memref<1x1x8x128xbf16, #tpu.memory_space<vmem>>, %arg6: memref<1x1x8x128xbf16, #tpu.memory_space<vmem>>) attributes {dimension_semantics = [#tpu.dimension_semantics<parallel>, #tpu.dimension_semantics<parallel>, #tpu.dimension_semantics<parallel>], iteration_bounds = array<i64: 2, 4, 1>, scalar_prefetch = 0 : i64, scratch_operands = 0 : i64, tpu.core_type = #tpu.core_type<tc>, window_params = [{transform_indices = @transform_0, window_bounds = array<i64: 1, 1, 8, 128>}, {transform_indices = @transform_1, window_bounds = array<i64: 1, 1, 8, 128>}, {transform_indices = @transform_2, window_bounds = array<i64: 1, 1, 8, 128>}, {transform_indices = @transform_3, window_bounds = array<i64: 1, 1, 8, 128>}]} {
    %c0 = arith.constant 0 : index
    %c0_0 = arith.constant 0 : index
    %c0_1 = arith.constant 0 : index
    %c0_2 = arith.constant 0 : index
    %0 = vector.load %arg3[%c0, %c0_0, %c0_1, %c0_2] : memref<1x1x8x128xbf16, #tpu.memory_space<vmem>>, vector<1x1x8x128xbf16>
    %1 = vector.shape_cast %0 : vector<1x1x8x128xbf16> to vector<8x128xbf16>
    %c0_3 = arith.constant 0 : index
    %c0_4 = arith.constant 0 : index
    %c0_5 = arith.constant 0 : index
    %c0_6 = arith.constant 0 : index
    %2 = vector.load %arg4[%c0_3, %c0_4, %c0_5, %c0_6] : memref<1x1x8x128xbf16, #tpu.memory_space<vmem>>, vector<1x1x8x128xbf16>
    %3 = vector.shape_cast %2 : vector<1x1x8x128xbf16> to vector<8x128xbf16>
    %c0_7 = arith.constant 0 : index
    %c0_8 = arith.constant 0 : index
    %c0_9 = arith.constant 0 : index
    %c0_10 = arith.constant 0 : index
    %4 = vector.load %arg5[%c0_7, %c0_8, %c0_9, %c0_10] : memref<1x1x8x128xbf16, #tpu.memory_space<vmem>>, vector<1x1x8x128xbf16>
    %5 = vector.shape_cast %4 : vector<1x1x8x128xbf16> to vector<8x128xbf16>
    %cst = arith.constant dense<0.000000e+00> : vector<128x128xf32>
    %6 = tpu.matmul %1, %3, %cst {dimension_numbers = #tpu.dot_dimension_numbers<[0], [0], [1], [1], [0, 1, 1, 1], [], []>} : vector<8x128xbf16>, vector<8x128xbf16>, vector<128x128xf32> -> vector<128x128xf32>
    %7 = tpu.iota {dimensions = array<i32: 1>} : vector<128x128xi32>
    %c16_i32 = arith.constant 16 : i32
    %8 = vector.broadcast %c16_i32 : i32 to vector<128x128xi32>
    %9 = arith.cmpi slt, %7, %8 : vector<128x128xi32>
    %cst_11 = arith.constant -1.000000e+30 : f32
    %10 = vector.broadcast %cst_11 : f32 to vector<128x128xf32>
    %11 = arith.select %9, %6, %10 : vector<128x128xi1>, vector<128x128xf32>
    %cst_12 = arith.constant dense<0xFF800000> : vector<128xf32>
    %12 = vector.multi_reduction <maximumf>, %11, %cst_12 [1] : vector<128x128xf32> to vector<128xf32>
    %13 = vector.shape_cast %12 : vector<128xf32> to vector<128x1xf32>
    %14 = vector.broadcast %13 : vector<128x1xf32> to vector<128x128xf32>
    %15 = arith.subf %11, %14 : vector<128x128xf32>
    %16 = math.exp %15 : vector<128x128xf32>
    %cst_13 = arith.constant dense<0.000000e+00> : vector<128xf32>
    %17 = vector.multi_reduction <add>, %16, %cst_13 [1] : vector<128x128xf32> to vector<128xf32>
    %18 = vector.shape_cast %17 : vector<128xf32> to vector<128x1xf32>
    %19 = tpu.reciprocal %18 {approx = true} : vector<128x1xf32> -> vector<128x1xf32>
    %20 = vector.broadcast %19 : vector<128x1xf32> to vector<128x128xf32>
    %21 = arith.mulf %16, %20 : vector<128x128xf32>
    %22 = arith.truncf %21 : vector<128x128xf32> to vector<128x128xbf16>
    %cst_14 = arith.constant dense<0.000000e+00> : vector<8x128xf32>
    %23 = tpu.matmul %5, %22, %cst_14 {dimension_numbers = #tpu.dot_dimension_numbers<[1], [1], [0], [0], [0, 0, 1, 0], [], []>} : vector<8x128xbf16>, vector<128x128xbf16>, vector<8x128xf32> -> vector<8x128xf32>
    %24 = arith.truncf %23 : vector<8x128xf32> to vector<8x128xbf16>
    %c0_15 = arith.constant 0 : index
    %c0_16 = arith.constant 0 : index
    %c0_17 = arith.constant 0 : index
    %c0_18 = arith.constant 0 : index
    %25 = vector.load %arg6[%c0_15, %c0_16, %c0_17, %c0_18] : memref<1x1x8x128xbf16, #tpu.memory_space<vmem>>, vector<1x1x8x128xbf16>
    %26 = vector.shape_cast %25 : vector<1x1x8x128xbf16> to vector<8x128xbf16>
    %27 = vector.shape_cast %24 : vector<8x128xbf16> to vector<1x1x8x128xbf16>
    tpu.vector_store %arg6[%c0_15, %c0_16, %c0_17, %c0_18], %27 {strides = array<i32>} : memref<1x1x8x128xbf16, #tpu.memory_space<vmem>>, vector<1x1x8x128xbf16>,
    return
  }
  func.func @transform_0(%arg0: i32, %arg1: i32, %arg2: i32) -> (i32, i32, i32, i32) {
    %c0_i32 = arith.constant 0 : i32
    %c0_i32_0 = arith.constant 0 : i32
    return %arg0, %arg1, %c0_i32, %arg2 : i32, i32, i32, i32
  }
  func.func @transform_1(%arg0: i32, %arg1: i32, %arg2: i32) -> (i32, i32, i32, i32) {
    %c0_i32 = arith.constant 0 : i32
    %c0_i32_0 = arith.constant 0 : i32
    %c0_i32_1 = arith.constant 0 : i32
    return %arg0, %arg1, %c0_i32, %c0_i32_0 : i32, i32, i32, i32
  }
  func.func @transform_2(%arg0: i32, %arg1: i32, %arg2: i32) -> (i32, i32, i32, i32) {
    %c0_i32 = arith.constant 0 : i32
    %c0_i32_0 = arith.constant 0 : i32
    %c0_i32_1 = arith.constant 0 : i32
    return %arg0, %arg1, %c0_i32, %c0_i32_0 : i32, i32, i32, i32
  }
  func.func @transform_3(%arg0: i32, %arg1: i32, %arg2: i32) -> (i32, i32, i32, i32) {
    %c0_i32 = arith.constant 0 : i32
    %c0_i32_0 = arith.constant 0 : i32
    return %arg0, %arg1, %c0_i32, %arg2 : i32, i32, i32, i32
  }
}

module attributes {stable_mosaic.version = 11 : i64} {
  func.func @_qkv_proj_kernel(%arg0: i32, %arg1: i32, %arg2: memref<1x32x128xf32, #tpu.memory_space<vmem>>, %arg3: memref<1x32x128xf32, #tpu.memory_space<vmem>>, %arg4: memref<1x32x128xf32, #tpu.memory_space<vmem>>, %arg5: memref<3x32x32xbf16, #tpu.memory_space<vmem>>, %arg6: memref<3x32x1xf32, #tpu.memory_space<vmem>>, %arg7: memref<1x32x128xbf16, #tpu.memory_space<vmem>>, %arg8: memref<1x32x128xbf16, #tpu.memory_space<vmem>>, %arg9: memref<1x32x128xbf16, #tpu.memory_space<vmem>>) attributes {dimension_semantics = [#tpu.dimension_semantics<parallel>, #tpu.dimension_semantics<parallel>], iteration_bounds = array<i64: 2, 1>, scalar_prefetch = 0 : i64, scratch_operands = 0 : i64, tpu.core_type = #tpu.core_type<tc>, window_params = [{transform_indices = @transform_0, window_bounds = array<i64: 1, 32, 128>}, {transform_indices = @transform_1, window_bounds = array<i64: 1, 32, 128>}, {transform_indices = @transform_2, window_bounds = array<i64: 1, 32, 128>}, {pipeline_mode = #tpu.pipeline_mode<synchronous>, transform_indices = @transform_3, window_bounds = array<i64: 3, 32, 32>}, {pipeline_mode = #tpu.pipeline_mode<synchronous>, transform_indices = @transform_4, window_bounds = array<i64: 3, 32, 1>}, {transform_indices = @transform_5, window_bounds = array<i64: 1, 32, 128>}, {transform_indices = @transform_6, window_bounds = array<i64: 1, 32, 128>}, {transform_indices = @transform_7, window_bounds = array<i64: 1, 32, 128>}]} {
    %c0 = arith.constant 0 : index
    %c0_0 = arith.constant 0 : index
    %c0_1 = arith.constant 0 : index
    %0 = vector.load %arg2[%c0, %c0_0, %c0_1] : memref<1x32x128xf32, #tpu.memory_space<vmem>>, vector<1x32x128xf32>
    %1 = vector.shape_cast %0 : vector<1x32x128xf32> to vector<32x128xf32>
    %2 = arith.truncf %1 : vector<32x128xf32> to vector<32x128xbf16>
    %c0_2 = arith.constant 0 : index
    %c0_3 = arith.constant 0 : index
    %c0_4 = arith.constant 0 : index
    %3 = vector.load %arg5[%c0_2, %c0_3, %c0_4] : memref<3x32x32xbf16, #tpu.memory_space<vmem>>, vector<1x32x32xbf16>
    %4 = vector.shape_cast %3 : vector<1x32x32xbf16> to vector<32x32xbf16>
    %cst = arith.constant dense<0.000000e+00> : vector<32x128xf32>
    %5 = tpu.matmul %4, %2, %cst {dimension_numbers = #tpu.dot_dimension_numbers<[1], [0], [0], [1], [0, 0, 1, 1], [], []>} : vector<32x32xbf16>, vector<32x128xbf16>, vector<32x128xf32> -> vector<32x128xf32>
    %c0_5 = arith.constant 0 : index
    %c0_6 = arith.constant 0 : index
    %c0_7 = arith.constant 0 : index
    %6 = vector.load %arg6[%c0_5, %c0_6, %c0_7] : memref<3x32x1xf32, #tpu.memory_space<vmem>>, vector<1x32x1xf32>
    %7 = vector.shape_cast %6 : vector<1x32x1xf32> to vector<32x1xf32>
    %8 = vector.broadcast %7 : vector<32x1xf32> to vector<32x128xf32>
    %9 = arith.addf %5, %8 : vector<32x128xf32>
    %10 = arith.truncf %9 : vector<32x128xf32> to vector<32x128xbf16>
    %c0_8 = arith.constant 0 : index
    %c0_9 = arith.constant 0 : index
    %c0_10 = arith.constant 0 : index
    %11 = vector.load %arg7[%c0_8, %c0_9, %c0_10] : memref<1x32x128xbf16, #tpu.memory_space<vmem>>, vector<1x32x128xbf16>
    %12 = vector.shape_cast %11 : vector<1x32x128xbf16> to vector<32x128xbf16>
    %13 = vector.shape_cast %10 : vector<32x128xbf16> to vector<1x32x128xbf16>
    tpu.vector_store %arg7[%c0_8, %c0_9, %c0_10], %13 {strides = array<i32>} : memref<1x32x128xbf16, #tpu.memory_space<vmem>>, vector<1x32x128xbf16>,
    %c0_11 = arith.constant 0 : index
    %c0_12 = arith.constant 0 : index
    %c0_13 = arith.constant 0 : index
    %14 = vector.load %arg3[%c0_11, %c0_12, %c0_13] : memref<1x32x128xf32, #tpu.memory_space<vmem>>, vector<1x32x128xf32>
    %15 = vector.shape_cast %14 : vector<1x32x128xf32> to vector<32x128xf32>
    %16 = arith.truncf %15 : vector<32x128xf32> to vector<32x128xbf16>
    %c1 = arith.constant 1 : index
    %c0_14 = arith.constant 0 : index
    %c0_15 = arith.constant 0 : index
    %17 = vector.load %arg5[%c1, %c0_14, %c0_15] : memref<3x32x32xbf16, #tpu.memory_space<vmem>>, vector<1x32x32xbf16>
    %18 = vector.shape_cast %17 : vector<1x32x32xbf16> to vector<32x32xbf16>
    %cst_16 = arith.constant dense<0.000000e+00> : vector<32x128xf32>
    %19 = tpu.matmul %18, %16, %cst_16 {dimension_numbers = #tpu.dot_dimension_numbers<[1], [0], [0], [1], [0, 0, 1, 1], [], []>} : vector<32x32xbf16>, vector<32x128xbf16>, vector<32x128xf32> -> vector<32x128xf32>
    %c1_17 = arith.constant 1 : index
    %c0_18 = arith.constant 0 : index
    %c0_19 = arith.constant 0 : index
    %20 = vector.load %arg6[%c1_17, %c0_18, %c0_19] : memref<3x32x1xf32, #tpu.memory_space<vmem>>, vector<1x32x1xf32>
    %21 = vector.shape_cast %20 : vector<1x32x1xf32> to vector<32x1xf32>
    %22 = vector.broadcast %21 : vector<32x1xf32> to vector<32x128xf32>
    %23 = arith.addf %19, %22 : vector<32x128xf32>
    %24 = arith.truncf %23 : vector<32x128xf32> to vector<32x128xbf16>
    %c0_20 = arith.constant 0 : index
    %c0_21 = arith.constant 0 : index
    %c0_22 = arith.constant 0 : index
    %25 = vector.load %arg8[%c0_20, %c0_21, %c0_22] : memref<1x32x128xbf16, #tpu.memory_space<vmem>>, vector<1x32x128xbf16>
    %26 = vector.shape_cast %25 : vector<1x32x128xbf16> to vector<32x128xbf16>
    %27 = vector.shape_cast %24 : vector<32x128xbf16> to vector<1x32x128xbf16>
    tpu.vector_store %arg8[%c0_20, %c0_21, %c0_22], %27 {strides = array<i32>} : memref<1x32x128xbf16, #tpu.memory_space<vmem>>, vector<1x32x128xbf16>,
    %c0_23 = arith.constant 0 : index
    %c0_24 = arith.constant 0 : index
    %c0_25 = arith.constant 0 : index
    %28 = vector.load %arg4[%c0_23, %c0_24, %c0_25] : memref<1x32x128xf32, #tpu.memory_space<vmem>>, vector<1x32x128xf32>
    %29 = vector.shape_cast %28 : vector<1x32x128xf32> to vector<32x128xf32>
    %30 = arith.truncf %29 : vector<32x128xf32> to vector<32x128xbf16>
    %c2 = arith.constant 2 : index
    %c0_26 = arith.constant 0 : index
    %c0_27 = arith.constant 0 : index
    %31 = vector.load %arg5[%c2, %c0_26, %c0_27] : memref<3x32x32xbf16, #tpu.memory_space<vmem>>, vector<1x32x32xbf16>
    %32 = vector.shape_cast %31 : vector<1x32x32xbf16> to vector<32x32xbf16>
    %cst_28 = arith.constant dense<0.000000e+00> : vector<32x128xf32>
    %33 = tpu.matmul %32, %30, %cst_28 {dimension_numbers = #tpu.dot_dimension_numbers<[1], [0], [0], [1], [0, 0, 1, 1], [], []>} : vector<32x32xbf16>, vector<32x128xbf16>, vector<32x128xf32> -> vector<32x128xf32>
    %c2_29 = arith.constant 2 : index
    %c0_30 = arith.constant 0 : index
    %c0_31 = arith.constant 0 : index
    %34 = vector.load %arg6[%c2_29, %c0_30, %c0_31] : memref<3x32x1xf32, #tpu.memory_space<vmem>>, vector<1x32x1xf32>
    %35 = vector.shape_cast %34 : vector<1x32x1xf32> to vector<32x1xf32>
    %36 = vector.broadcast %35 : vector<32x1xf32> to vector<32x128xf32>
    %37 = arith.addf %33, %36 : vector<32x128xf32>
    %38 = arith.truncf %37 : vector<32x128xf32> to vector<32x128xbf16>
    %c0_32 = arith.constant 0 : index
    %c0_33 = arith.constant 0 : index
    %c0_34 = arith.constant 0 : index
    %39 = vector.load %arg9[%c0_32, %c0_33, %c0_34] : memref<1x32x128xbf16, #tpu.memory_space<vmem>>, vector<1x32x128xbf16>
    %40 = vector.shape_cast %39 : vector<1x32x128xbf16> to vector<32x128xbf16>
    %41 = vector.shape_cast %38 : vector<32x128xbf16> to vector<1x32x128xbf16>
    tpu.vector_store %arg9[%c0_32, %c0_33, %c0_34], %41 {strides = array<i32>} : memref<1x32x128xbf16, #tpu.memory_space<vmem>>, vector<1x32x128xbf16>,
    return
  }
  func.func @transform_0(%arg0: i32, %arg1: i32) -> (i32, i32, i32) {
    %c0_i32 = arith.constant 0 : i32
    %c0_i32_0 = arith.constant 0 : i32
    return %arg0, %c0_i32, %arg1 : i32, i32, i32
  }
  func.func @transform_1(%arg0: i32, %arg1: i32) -> (i32, i32, i32) {
    %c0_i32 = arith.constant 0 : i32
    %c0_i32_0 = arith.constant 0 : i32
    return %arg0, %c0_i32, %arg1 : i32, i32, i32
  }
  func.func @transform_2(%arg0: i32, %arg1: i32) -> (i32, i32, i32) {
    %c0_i32 = arith.constant 0 : i32
    %c0_i32_0 = arith.constant 0 : i32
    return %arg0, %c0_i32, %arg1 : i32, i32, i32
  }
  func.func @transform_3(%arg0: i32, %arg1: i32) -> (i32, i32, i32) {
    %c0_i32 = arith.constant 0 : i32
    %c0_i32_0 = arith.constant 0 : i32
    %c0_i32_1 = arith.constant 0 : i32
    %c0_i32_2 = arith.constant 0 : i32
    return %c0_i32, %c0_i32_0, %c0_i32_1 : i32, i32, i32
  }
  func.func @transform_4(%arg0: i32, %arg1: i32) -> (i32, i32, i32) {
    %c0_i32 = arith.constant 0 : i32
    %c0_i32_0 = arith.constant 0 : i32
    %c0_i32_1 = arith.constant 0 : i32
    %c0_i32_2 = arith.constant 0 : i32
    return %c0_i32, %c0_i32_0, %c0_i32_1 : i32, i32, i32
  }
  func.func @transform_5(%arg0: i32, %arg1: i32) -> (i32, i32, i32) {
    %c0_i32 = arith.constant 0 : i32
    %c0_i32_0 = arith.constant 0 : i32
    return %arg0, %c0_i32, %arg1 : i32, i32, i32
  }
  func.func @transform_6(%arg0: i32, %arg1: i32) -> (i32, i32, i32) {
    %c0_i32 = arith.constant 0 : i32
    %c0_i32_0 = arith.constant 0 : i32
    return %arg0, %c0_i32, %arg1 : i32, i32, i32
  }
  func.func @transform_7(%arg0: i32, %arg1: i32) -> (i32, i32, i32) {
    %c0_i32 = arith.constant 0 : i32
    %c0_i32_0 = arith.constant 0 : i32
    return %arg0, %c0_i32, %arg1 : i32, i32, i32
  }
}

module attributes {stable_mosaic.version = 11 : i64} {
  func.func @_conv1x1_kernel(%arg0: i32, %arg1: i32, %arg2: memref<1x32x128xbf16, #tpu.memory_space<vmem>>, %arg3: memref<32x32xbf16, #tpu.memory_space<vmem>>, %arg4: memref<32x1xf32, #tpu.memory_space<vmem>>, %arg5: memref<1x32x128xf32, #tpu.memory_space<vmem>>) attributes {dimension_semantics = [#tpu.dimension_semantics<parallel>, #tpu.dimension_semantics<parallel>], iteration_bounds = array<i64: 2, 1>, scalar_prefetch = 0 : i64, scratch_operands = 0 : i64, tpu.core_type = #tpu.core_type<tc>, window_params = [{transform_indices = @transform_0, window_bounds = array<i64: 1, 32, 128>}, {pipeline_mode = #tpu.pipeline_mode<synchronous>, transform_indices = @transform_1, window_bounds = array<i64: 32, 32>}, {pipeline_mode = #tpu.pipeline_mode<synchronous>, transform_indices = @transform_2, window_bounds = array<i64: 32, 1>}, {transform_indices = @transform_3, window_bounds = array<i64: 1, 32, 128>}]} {
    %c0 = arith.constant 0 : index
    %c0_0 = arith.constant 0 : index
    %c0_1 = arith.constant 0 : index
    %0 = vector.load %arg2[%c0, %c0_0, %c0_1] : memref<1x32x128xbf16, #tpu.memory_space<vmem>>, vector<1x32x128xbf16>
    %1 = vector.shape_cast %0 : vector<1x32x128xbf16> to vector<32x128xbf16>
    %c0_2 = arith.constant 0 : index
    %c0_3 = arith.constant 0 : index
    %2 = vector.load %arg3[%c0_2, %c0_3] : memref<32x32xbf16, #tpu.memory_space<vmem>>, vector<32x32xbf16>
    %cst = arith.constant dense<0.000000e+00> : vector<32x128xf32>
    %3 = tpu.matmul %2, %1, %cst {dimension_numbers = #tpu.dot_dimension_numbers<[1], [0], [0], [1], [0, 0, 1, 1], [], []>} : vector<32x32xbf16>, vector<32x128xbf16>, vector<32x128xf32> -> vector<32x128xf32>
    %c0_4 = arith.constant 0 : index
    %c0_5 = arith.constant 0 : index
    %4 = vector.load %arg4[%c0_4, %c0_5] : memref<32x1xf32, #tpu.memory_space<vmem>>, vector<32x1xf32>
    %5 = vector.broadcast %4 : vector<32x1xf32> to vector<32x128xf32>
    %6 = arith.addf %3, %5 : vector<32x128xf32>
    %c0_6 = arith.constant 0 : index
    %c0_7 = arith.constant 0 : index
    %c0_8 = arith.constant 0 : index
    %7 = vector.load %arg5[%c0_6, %c0_7, %c0_8] : memref<1x32x128xf32, #tpu.memory_space<vmem>>, vector<1x32x128xf32>
    %8 = vector.shape_cast %7 : vector<1x32x128xf32> to vector<32x128xf32>
    %9 = vector.shape_cast %6 : vector<32x128xf32> to vector<1x32x128xf32>
    tpu.vector_store %arg5[%c0_6, %c0_7, %c0_8], %9 {strides = array<i32>} : memref<1x32x128xf32, #tpu.memory_space<vmem>>, vector<1x32x128xf32>,
    return
  }
  func.func @transform_0(%arg0: i32, %arg1: i32) -> (i32, i32, i32) {
    %c0_i32 = arith.constant 0 : i32
    %c0_i32_0 = arith.constant 0 : i32
    return %arg0, %c0_i32, %arg1 : i32, i32, i32
  }
  func.func @transform_1(%arg0: i32, %arg1: i32) -> (i32, i32) {
    %c0_i32 = arith.constant 0 : i32
    %c0_i32_0 = arith.constant 0 : i32
    %c0_i32_1 = arith.constant 0 : i32
    return %c0_i32, %c0_i32_0 : i32, i32
  }
  func.func @transform_2(%arg0: i32, %arg1: i32) -> (i32, i32) {
    %c0_i32 = arith.constant 0 : i32
    %c0_i32_0 = arith.constant 0 : i32
    %c0_i32_1 = arith.constant 0 : i32
    return %c0_i32, %c0_i32_0 : i32, i32
  }
  func.func @transform_3(%arg0: i32, %arg1: i32) -> (i32, i32, i32) {
    %c0_i32 = arith.constant 0 : i32
    %c0_i32_0 = arith.constant 0 : i32
    return %arg0, %c0_i32, %arg1 : i32, i32, i32
  }
}

</mosaic_0001>

<bundles_post_ra>
// kernel: multi_headed_attention.5
= control target key start
LH: loop header
LB: loop body
LE: loop exit
PB: predicated region body
PF: predicated region fallthrough
CT: control target
= control target key end

     0   :  { %s507_s12 = smov 0   ;;  %s509_s13 = smov 0   ;;  %s560_s0 = inlined_call_operand.vmem [shape: bf16[2,32,128], index: 0, kind: input, shape index: {}]   ;;  %s561_s1 = inlined_call_operand.vmem [shape: bf16[32,32], index: 1, kind: input, shape index: {}]   ;;  %s562_s2 = inlined_call_operand.vmem [shape: f32[32,1], index: 2, kind: input, shape index: {}]   ;;  %s563_s3 = inlined_call_operand.vmem [shape: f32[2,32,128], index: 3, kind: output, shape index: {}]  }
   0x1   :  { %s511_s14 = smov 0  }
   0x2 LB: > { %s25_s15 = sadd.s32 1, %s480_s13  ;;  %p404_p0 = scmp.ge.s32.totalorder %s484_s14, 1  ;;  %s484_s14 = sphi %s511_s14, %s13_s14   ;;  %s480_s13 = sphi %s509_s13, %s565_s13   ;;  %s476_s12 = sphi %s507_s12, %s564_s12  }
   0x3   : > { %p27_p1 = scmp.ge.s32.totalorder %s25_s15, 2  ;;  %p156_p2 = scmp.lt.s32.totalorder %s484_s14, 3 }
   0x5   : > { %s567_s15 = smov (%p27_p1, %s25_s15), 0  ;;  %p157_p3 = pnand %p404_p0, %p156_p2 }
   0x6   : > { %p186_p4 = scmp.lt.s32.totalorder (!%p157_p3), %s476_s12, 1  ;;  %v460_v0 = vld [vmem:[%s561_s1] sm:$0xff] (!%p157_p3)   ;;  %vm257_vm0 = vcmask (!%p157_p3), 261120   ;;  %v213_v1 = vld [vmem:[%s562_s2 + $0x10] sm:$0xff] (!%p157_p3)  ;;  %v486_v3 = vmov (!%p157_p3), 0   ;;  %v214_v4 = vld [vmem:[%s562_s2 + $0x18] sm:$0xff] (!%p157_p3) }
   0x7   : > { %160 = sbr.rel (%p157_p3) target bundleno = 244 (0xf4), region = 32  ;;  %427 = vmatprep.mubr.msk.bf16.mxu0 (!%p157_p3), %vm257_vm0, %v460_v0  ;;  %v211_v2 = vld [vmem:[%s562_s2] sm:$0xff] (!%p157_p3)  ;;  %457 = vset.pattern.permute.xlu1 (!%p157_p3), %v486_v3  ;;  %v212_v5 = vld [vmem:[%s562_s2 + $0x8] sm:$0xff] (!%p157_p3) }
   0x8   : > { %456 = vset.pattern.permute.xlu0 (!%p157_p3), %v486_v3  ;;  %227 = vperm.xlu1 (!%p157_p3), %457, %v213_v1   ;;  %v461_v8 = vld [vmem:[%s561_s1 + $0x8] sm:$0xff] (!%p157_p3)  }
   0x9   : > { %217 = vperm.xlu0 (!%p157_p3), %456, %v211_v2  }
   0xc   : > { %232 = vperm.xlu1 (!%p157_p3), %457, %v214_v4  }
   0xd   : > { %222 = vperm.xlu0 (!%p157_p3), %456, %v212_v5  }
   0xe   : > { %s569_s12 = smov (!%p186_p4, %s476_s12), 1 }
   0xf   : > { %s417_s22 = sshll.u32 %s569_s12, 4  ;;  %s418_s5 = sshll.u32 %s569_s12, 5 }
  0x10   : > { %s193_s25 = scalar_lea.vmem %s560_s0, %s417_s22  ;;  %s201_s8 = scalar_lea.vmem %s563_s3, %s418_s5 }
  0x11   : > { %v458_v6 = vld [vmem:[%s193_s25] sm:$0xff]   ;;  %v459_v7 = vld [vmem:[%s193_s25 + $0x8] sm:$0xff]  }
  0x12   : > { %423 = vmatprep.subr.bf16.mxu0 %v458_v6 }
  0x13   : > { %424 = vmatpush3.bf16.msra.mxu0 %v458_v6 }
  0x14   : > { %425 = vmatprep.subr.bf16.mxu0 %v459_v7 }
  0x17   : > { %426 = vmatpush3.bf16.msra.mxu0 %v459_v7 }
  0x1a   : > { %428 = vmatmul.mubr.msk.bf16.vlgmr.msra.gmra.mrb[0].mxu0 %vm257_vm0, %v461_v8 }
  0x87   : > { %v228_v9 = vpop.permute.xlu1 %227 }
  0x88   : > { %v218_v10 = vpop.permute.xlu0 %217 }
  0x8b   : > { %v233_v14 = vpop.permute.xlu1 %232 }
  0x8c   : > { %v223_v17 = vpop.permute.xlu0 %222 }
  0xed   : > { %v429_v11 = vpop.f32.mrb[0].mxu0 }
  0xee   : > { %v307_v12 = vadd.f32 %v429_v11, %v228_v9  ;;  %v298_v13 = vpop.f32.mrb[1].mxu0 }
  0xef   : > { %v299_v15 = vadd.f32 %v298_v13, %v218_v10  ;;  %v430_v16 = vpop.f32.mrb[2].mxu0 }
  0xf0   : > { %315 = vst [vmem:[%s201_s8 + $0x10] sm:$0xff] %v307_v12  ;;  %v310_v18 = vadd.f32 %v430_v16, %v233_v14  ;;  %v301_v19 = vpop.f32.mrb[3].mxu0 }
  0xf1   : > { %313 = vst [vmem:[%s201_s8] sm:$0xff] %v299_v15  ;;  %v302_v20 = vadd.f32 %v301_v19, %v223_v17 }
  0xf2   : > { %316 = vst [vmem:[%s201_s8 + $0x18] sm:$0xff] %v310_v18 }
  0xf3   : > { %314 = vst [vmem:[%s201_s8 + $0x8] sm:$0xff] %v302_v20 }
  0xf4 PF: > { %s13_s14 = sadd.s32 1, %s484_s14   ;;  %s564_s12 = smov %s480_s13 }
  0xf5   : > { %p10_p5 = scmp.ge.s32.totalorder %s13_s14, 4   ;;  %s565_s13 = smov %s567_s15 }
  0xf7   :  { %12 = sbr.rel (!%p10_p5) target bundleno = 2 (0x2), region = 62 }

// kernel: multi_headed_attention.4
= control target key start
LH: loop header
LB: loop body
LE: loop exit
PB: predicated region body
PF: predicated region fallthrough
CT: control target
= control target key end

     0   :  { %s1036_s12 = smov 0   ;;  %s1038_s13 = smov 0   ;;  %s1220_s0 = inlined_call_operand.vmem [shape: bf16[2,4,8,128], index: 0, kind: input, shape index: {}]   ;;  %s1221_s1 = inlined_call_operand.vmem [shape: bf16[2,4,8,128], index: 1, kind: input, shape index: {}]   ;;  %s1222_s2 = inlined_call_operand.vmem [shape: bf16[2,4,8,128], index: 2, kind: input, shape index: {}]   ;;  %s1223_s3 = inlined_call_operand.vmem [shape: bf16[2,4,8,128], index: 3, kind: output, shape index: {}]  }
   0x1   :  { %s1040_s14 = smov 0   ;;  %s1042_s15 = smov 0  }
   0x2   :  { %s1044_s16 = smov 0  }
   0x3 LB: > { %s28_s17 = sadd.s32 1, %s1004_s14  ;;  %s32_s18 = sadd.s32 1, %s1008_s15  ;;  %s1012_s16 = sphi %s1044_s16, %s13_s16   ;;  %s1008_s15 = sphi %s1042_s15, %s1227_s15   ;;  %s1004_s14 = sphi %s1040_s14, %s1226_s14   ;;  %s1000_s13 = sphi %s1038_s13, %s1225_s13   ;;  %s996_s12 = sphi %s1036_s12, %s1224_s12  }
   0x4   : > { %p30_p0 = scmp.ge.s32.totalorder %s28_s17, 4  ;;  %p791_p1 = scmp.ge.s32.totalorder %s1012_s16, 1 }
   0x5   : > { %p200_p2 = scmp.lt.s32.totalorder %s1012_s16, 9 }
   0x6   : > { %s1229_s17 = smov (%p30_p0, %s28_s17), 0  ;;  %s1231_s18 = smov (!%p30_p0, %s32_s18), %s1008_s15 }
   0x7   : > { %p201_p3 = pnand %p791_p1, %p200_p2  ;;  %p34_p4 = scmp.ge.s32.totalorder %s1231_s18, 2 }
   0x8   : > { %p252_p5 = scmp.lt.s32.totalorder (!%p201_p3), %s1000_s13, 1  ;;  %p254_p6 = scmp.lt.s32.totalorder (!%p201_p3), %s996_s12, 3  ;;  %vm335_vm0 = vcmask (!%p201_p3), 1043456   ;;  %vm310_vm1 = vcmask (!%p201_p3), 64512   ;;  %v436_v11 = vlaneseq (!%p201_p3)  ;;  %vm1015_vm3 = vmmov (!%p201_p3), 0  }
   0x9   : > { %s1233_s18 = smov (%p34_p4, %s1231_s18), 0  ;;  %204 = sbr.rel (%p201_p3) target bundleno = 937 (0x3a9), region = 32 }
   0xa   : > { %v437_v12 = vand.u32 (!%p201_p3), 127, %v436_v11 }
   0xc   : > { %vm438_vm2 = vcmp.lt.s32.totalorder (!%p201_p3), %v437_v12, 16 }
  0x10   : > { %s1235_s13 = smov (!%p252_p5, %s1000_s13), 1  ;;  %s1237_s12 = smov (!%p254_p6, %s996_s12), 3 }
  0x11   : > { %s792_s19 = sshll.u32 %s1235_s13, 2 }
  0x12   : > { %s260_s20 = sadd.s32 %s792_s19, %s1237_s12 }
  0x13   : > { %s1066_s21 = sshll.u32 %s260_s20, 2 }
  0x14   : > { %s262_s24 = scalar_lea.vmem %s1220_s0, %s1066_s21  ;;  %s270_s27 = scalar_lea.vmem %s1221_s1, %s1066_s21 }
  0x15   : > { %v291_v0 = vld [vmem:[%s262_s24] sm:$0xf]  ;;  %s278_s30 = scalar_lea.vmem %s1222_s2, %s1066_s21  ;;  %s289_s6 = scalar_lea.vmem %s1223_s3, %s1066_s21 }
  0x16   : > { %v292_v1 = vld [vmem:[%s270_s27] sm:$0xf]  ;;  %294 = vxpose.xlu0.c.b16.start.end [1/1] (short) %v291_v0, 128 }
  0x17   : > { %866 = vmatprep.subr.msk.bf16.mxu0 %vm335_vm0, %v292_v1  ;;  %v337_v2 = vsel %vm335_vm0, %v292_v1, 0 }
  0x18   : > { %829 = vmatpush3.bf16.msra.mxu0 %v337_v2 }
  0x7c   : > { %v302_v3 = vpop.trf.xlu0 }
  0x7d   : > { %830 = vmatprep.mubr.msk.bf16.mxu0 %vm310_vm1, %v302_v3 }
  0x80   : > { %v303_v4 = vpop.trf.xlu0 }
  0x81   : > { %831 = vmatmul.mubr.msk.bf16.vlgmr.msra.gmra.mrb[0].mxu0 %vm310_vm1, %v303_v4 }
  0x84   : > { %v304_v5 = vpop.trf.xlu0 }
  0x85   : > { %834 = vmatprep.mubr.msk.bf16.mxu0 %vm310_vm1, %v304_v5 }
  0x88   : > { %v305_v6 = vpop.trf.xlu0 }
  0x89   : > { %835 = vmatmul.mubr.msk.bf16.gmra.mrb[4].mxu0 %vm310_vm1, %v305_v6 }
  0x8c   : > { %v306_v7 = vpop.trf.xlu0 }
  0x8d   : > { %838 = vmatprep.mubr.msk.bf16.mxu0 %vm310_vm1, %v306_v7 }
  0x90   : > { %v307_v8 = vpop.trf.xlu0 }
  0x91   : > { %839 = vmatmul.mubr.msk.bf16.gmra.mrb[8].mxu0 %vm310_vm1, %v307_v8 }
  0x94   : > { %v308_v9 = vpop.trf.xlu0 }
  0x95   : > { %842 = vmatprep.mubr.msk.bf16.mxu0 %vm310_vm1, %v308_v9 }
  0x98   : > { %v309_v10 = vpop.trf.xlu0 }
  0x99   : > { %843 = vmatmul.mubr.msk.bf16.gmra.mrb[12].mxu0 %vm310_vm1, %v309_v10 }
 0x154   : > { %v832_v13 = vpop.f32.mrb[0].mxu0 }
 0x155   : > { %v373_v14 = vpop.f32.mrb[1].mxu0  ;;  %v441_v19 = vsel %vm438_vm2, %v832_v13, -1e+30 }
 0x156   : > { %v833_v15 = vpop.f32.mrb[2].mxu0  ;;  %v439_v16 = vsel %vm438_vm2, %v373_v14, -1e+30 }
 0x157   : > { %455 = vmax.xlane.f32.xlu0 %v439_v16  ;;  %v376_v17 = vpop.f32.mrb[3].mxu0  ;;  %v442_v24 = vsel %vm438_vm2, %v833_v15, -1e+30 }
 0x158   : > { %v440_v18 = vsel %vm438_vm2, %v376_v17, -1e+30 }
 0x159   : > { %457 = vmax.xlane.f32.xlu1 %v440_v18 }
 0x15c   : > { %v836_v20 = vpop.f32.mrb[4].mxu0 }
 0x15d   : > { %459 = vmax.xlane.f32.xlu1 %v441_v19  ;;  %v389_v21 = vpop.f32.mrb[5].mxu0  ;;  %v445_v32 = vsel %vm438_vm2, %v836_v20, -1e+30 }
 0x15e   : > { %v837_v22 = vpop.f32.mrb[6].mxu0  ;;  %v443_v25 = vsel %vm438_vm2, %v389_v21, -1e+30 }
 0x15f   : > { %v392_v23 = vpop.f32.mrb[7].mxu0  ;;  %v446_v36 = vsel %vm438_vm2, %v837_v22, -1e+30 }
 0x160   : > { %v444_v30 = vsel %vm438_vm2, %v392_v23, -1e+30 }
 0x161   : > { %461 = vmax.xlane.f32.xlu1 %v442_v24 }
 0x164   : > { %v840_v26 = vpop.f32.mrb[8].mxu0 }
 0x165   : > { %463 = vmax.xlane.f32.xlu1 %v443_v25  ;;  %v405_v27 = vpop.f32.mrb[9].mxu0  ;;  %v1103_v41 = vsel %vm438_vm2, %v840_v26, -1e+30 }
 0x166   : > { %v841_v28 = vpop.f32.mrb[10].mxu0  ;;  %v447_v38 = vsel %vm438_vm2, %v405_v27, -1e+30 }
 0x167   : > { %v408_v29 = vpop.f32.mrb[11].mxu0  ;;  %v1107_v42 = vsel %vm438_vm2, %v841_v28, -1e+30 }
 0x168   : > { %v448_v40 = vsel %vm438_vm2, %v408_v29, -1e+30  ;;  %v1014_v29 = vmov 0.0  }
 0x169   : > { %465 = vmax.xlane.f32.xlu1 %v444_v30  ;;  %846 = vmatprep.subr.bf16.mxu1 %v1014_v29 }
 0x16a   : > { %862 = vmatprep.mubr.msk.bf16.mxu1 %vm1015_vm3, %v1014_v29 }
 0x16c   : > { %v844_v31 = vpop.f32.mrb[12].mxu0 }
 0x16d   : > { %467 = vmax.xlane.f32.xlu1 %v445_v32  ;;  %v421_v33 = vpop.f32.mrb[13].mxu0  ;;  %v1115_v44 = vsel %vm438_vm2, %v844_v31, -1e+30 }
 0x16e   : > { %v845_v34 = vpop.f32.mrb[14].mxu0  ;;  %v1111_v43 = vsel %vm438_vm2, %v421_v33, -1e+30 }
 0x16f   : > { %v424_v35 = vpop.f32.mrb[15].mxu0  ;;  %v1098_v39 = vsel %vm438_vm2, %v845_v34, -1e+30 }
 0x170   : > { %v1093_v37 = vsel %vm438_vm2, %v424_v35, -1e+30 }
 0x171   : > { %469 = vmax.xlane.f32.xlu1 %v446_v36  ;;  %481 = vmax.xlane.f32.xlu0 %v1093_v37 }
 0x175   : > { %471 = vmax.xlane.f32.xlu1 %v447_v38  ;;  %485 = vmax.xlane.f32.xlu0 %v1098_v39 }
 0x179   : > { %473 = vmax.xlane.f32.xlu1 %v448_v40 }
 0x17d   : > { %475 = vmax.xlane.f32.xlu1 %v1103_v41 }
 0x181   : > { %477 = vmax.xlane.f32.xlu1 %v1107_v42 }
 0x185   : > { %479 = vmax.xlane.f32.xlu1 %v1111_v43 }
 0x189   : > { %483 = vmax.xlane.f32.xlu1 %v1115_v44 }
 0x1e4   : > { %v456_v45 = vpop.xlane.xlu0 %455 }
 0x1e5   : > { %v487_v46 = vsub.f32 %v439_v16, %v456_v45 }
 0x1e6   : > { %v458_v47 = vpop.xlane.xlu1 %457 }
 0x1e7   : > { %v503_v48 = vmul.f32 1.442695, %v487_v46  ;;  %v488_v49 = vsub.f32 %v440_v18, %v458_v47 }
 0x1e9   : > { %910 = vpow2.f32 %v503_v48  ;;  %v505_v50 = vmul.f32 1.442695, %v488_v49 }
 0x1ea   : > { %v460_v51 = vpop.xlane.xlu1 %459 }
 0x1eb   : > { %912 = vpow2.f32 %v505_v50  ;;  %v489_v52 = vsub.f32 %v441_v19, %v460_v51 }
 0x1ed   : > { %v507_v53 = vmul.f32 1.442695, %v489_v52 }
 0x1ee   : > { %v462_v54 = vpop.xlane.xlu1 %461 }
 0x1ef   : > { %914 = vpow2.f32 %v507_v53  ;;  %v490_v55 = vsub.f32 %v442_v24, %v462_v54 }
 0x1f1   : > { %v509_v56 = vmul.f32 1.442695, %v490_v55 }
 0x1f2   : > { %v464_v57 = vpop.xlane.xlu1 %463 }
 0x1f3   : > { %v1118_v58 = vpop.eup %910  ;;  %916 = vpow2.f32 %v509_v56  ;;  %v491_v59 = vsub.f32 %v443_v25, %v464_v57 }
 0x1f4   : > { %535 = vadd.xlane.f32.xlu1 %v1118_v58 }
 0x1f5   : > { %v1121_v60 = vpop.eup %912  ;;  %v511_v61 = vmul.f32 1.442695, %v491_v59 }
 0x1f6   : > { %v466_v62 = vpop.xlane.xlu1 %465  ;;  %537 = vadd.xlane.f32.xlu0 %v1121_v60 }
 0x1f7   : > { %918 = vpow2.f32 %v511_v61  ;;  %v492_v63 = vsub.f32 %v444_v30, %v466_v62 }
 0x1f9   : > { %v1124_v0 = vpop.eup %914  ;;  %v513_v1 = vmul.f32 1.442695, %v492_v63 }
 0x1fa   : > { %v468_v2 = vpop.xlane.xlu1 %467  ;;  %539 = vadd.xlane.f32.xlu1 %v1124_v0 }
 0x1fb   : > { %920 = vpow2.f32 %v513_v1  ;;  %v493_v3 = vsub.f32 %v445_v32, %v468_v2 }
 0x1fd   : > { %v1127_v4 = vpop.eup %916  ;;  %v515_v5 = vmul.f32 1.442695, %v493_v3 }
 0x1fe   : > { %v470_v6 = vpop.xlane.xlu1 %469  ;;  %541 = vadd.xlane.f32.xlu0 %v1127_v4  ;;  %v482_v17 = vpop.xlane.xlu0 %481 }
 0x1ff   : > { %922 = vpow2.f32 %v515_v5  ;;  %v494_v7 = vsub.f32 %v446_v36, %v470_v6  ;;  %v500_v23 = vsub.f32 %v1093_v37, %v482_v17 }
 0x201   : > { %v1130_v8 = vpop.eup %918  ;;  %v517_v9 = vmul.f32 1.442695, %v494_v7  ;;  %v529_v30 = vmul.f32 1.442695, %v500_v23 }
 0x202   : > { %v472_v10 = vpop.xlane.xlu1 %471  ;;  %543 = vadd.xlane.f32.xlu1 %v1130_v8  ;;  %v486_v25 = vpop.xlane.xlu0 %485 }
 0x203   : > { %924 = vpow2.f32 %v517_v9  ;;  %v495_v11 = vsub.f32 %v447_v38, %v472_v10  ;;  %v502_v31 = vsub.f32 %v1098_v39, %v486_v25 }
 0x205   : > { %v1133_v12 = vpop.eup %920  ;;  %v519_v13 = vmul.f32 1.442695, %v495_v11  ;;  %v533_v36 = vmul.f32 1.442695, %v502_v31 }
 0x206   : > { %v474_v14 = vpop.xlane.xlu1 %473  ;;  %545 = vadd.xlane.f32.xlu0 %v1133_v12 }
 0x207   : > { %926 = vpow2.f32 %v519_v13  ;;  %v496_v15 = vsub.f32 %v448_v40, %v474_v14 }
 0x209   : > { %v1136_v16 = vpop.eup %922  ;;  %v521_v18 = vmul.f32 1.442695, %v496_v15 }
 0x20a   : > { %v476_v19 = vpop.xlane.xlu1 %475  ;;  %547 = vadd.xlane.f32.xlu1 %v1136_v16 }
 0x20b   : > { %928 = vpow2.f32 %v521_v18  ;;  %v497_v20 = vsub.f32 %v1103_v41, %v476_v19 }
 0x20d   : > { %v1140_v21 = vpop.eup %924  ;;  %v523_v22 = vmul.f32 1.442695, %v497_v20 }
 0x20e   : > { %v478_v24 = vpop.xlane.xlu1 %477  ;;  %549 = vadd.xlane.f32.xlu0 %v1140_v21 }
 0x20f   : > { %930 = vpow2.f32 %v523_v22  ;;  %v498_v26 = vsub.f32 %v1107_v42, %v478_v24 }
 0x211   : > { %v1145_v27 = vpop.eup %926  ;;  %v525_v28 = vmul.f32 1.442695, %v498_v26 }
 0x212   : > { %v480_v32 = vpop.xlane.xlu1 %479  ;;  %551 = vadd.xlane.f32.xlu1 %v1145_v27 }
 0x213   : > { %932 = vpow2.f32 %v525_v28  ;;  %v499_v33 = vsub.f32 %v1111_v43, %v480_v32 }
 0x214   : > { %934 = vpow2.f32 %v529_v30 }
 0x215   : > { %v1151_v34 = vpop.eup %928  ;;  %v527_v35 = vmul.f32 1.442695, %v499_v33 }
 0x216   : > { %v484_v37 = vpop.xlane.xlu1 %483  ;;  %553 = vadd.xlane.f32.xlu0 %v1151_v34 }
 0x217   : > { %936 = vpow2.f32 %v527_v35  ;;  %v501_v38 = vsub.f32 %v1115_v44, %v484_v37 }
 0x218   : > { %938 = vpow2.f32 %v533_v36 }
 0x219   : > { %v1155_v40 = vpop.eup %930  ;;  %v531_v39 = vmul.f32 1.442695, %v501_v38 }
 0x21a   : > { %555 = vadd.xlane.f32.xlu1 %v1155_v40 }
 0x21b   : > { %940 = vpow2.f32 %v531_v39 }
 0x21d   : > { %v1158_v41 = vpop.eup %932 }
 0x21e   : > { %557 = vadd.xlane.f32.xlu0 %v1158_v41  ;;  %v1161_v42 = vpop.eup %934 }
 0x221   : > { %v1163_v43 = vpop.eup %936 }
 0x222   : > { %559 = vadd.xlane.f32.xlu1 %v1163_v43  ;;  %561 = vadd.xlane.f32.xlu0 %v1161_v42  ;;  %v1167_v44 = vpop.eup %938 }
 0x225   : > { %v1169_v45 = vpop.eup %940 }
 0x226   : > { %563 = vadd.xlane.f32.xlu1 %v1169_v45  ;;  %565 = vadd.xlane.f32.xlu0 %v1167_v44 }
 0x281   : > { %v536_v46 = vpop.xlane.xlu1 %535 }
 0x282   : > { %942 = vrcp.f32 %v536_v46 }
 0x283   : > { %v538_v47 = vpop.xlane.xlu0 %537 }
 0x284   : > { %944 = vrcp.f32 %v538_v47 }
 0x287   : > { %v540_v48 = vpop.xlane.xlu1 %539 }
 0x288   : > { %946 = vrcp.f32 %v540_v48 }
 0x28b   : > { %v542_v49 = vpop.xlane.xlu0 %541 }
 0x28c   : > { %v943_v50 = vpop.eup %942  ;;  %948 = vrcp.f32 %v542_v49 }
 0x28d   : > { %v583_v53 = vmul.f32 %v943_v50, %v1118_v58 }
 0x28e   : > { %v945_v51 = vpop.eup %944 }
 0x28f   : > { %v544_v52 = vpop.xlane.xlu1 %543  ;;  %v584_v54 = vmul.f32 %v945_v51, %v1121_v60 }
 0x290   : > { %950 = vrcp.f32 %v544_v52 }
 0x291   : > { %v599_v55 = vpack.c.bf16 %v584_v54, %v583_v53 }
 0x292   : > { %v947_v57 = vpop.eup %946 }
 0x293   : > { %847 = vmatpush3.bf16.xpose.msra.mxu1 %v599_v55  ;;  %v546_v56 = vpop.xlane.xlu0 %545  ;;  %v585_v62 = vmul.f32 %v947_v57, %v1124_v0 }
 0x294   : > { %952 = vrcp.f32 %v546_v56  ;;  %848 = vmatprep.subr.bf16.mxu1 %v1014_v29 }
 0x296   : > { %v949_v59 = vpop.eup %948 }
 0x297   : > { %v548_v61 = vpop.xlane.xlu1 %547  ;;  %v586_v63 = vmul.f32 %v949_v59, %v1127_v4 }
 0x298   : > { %954 = vrcp.f32 %v548_v61 }
 0x299   : > { %v600_v1 = vpack.c.bf16 %v586_v63, %v585_v62 }
 0x29a   : > { %v951_v2 = vpop.eup %950 }
 0x29b   : > { %849 = vmatpush3.bf16.xpose.msra.mxu1 %v600_v1  ;;  %v550_v58 = vpop.xlane.xlu0 %549  ;;  %v587_v5 = vmul.f32 %v951_v2, %v1130_v8 }
 0x29c   : > { %956 = vrcp.f32 %v550_v58  ;;  %850 = vmatprep.subr.bf16.mxu1 %v1014_v29 }
 0x29e   : > { %v953_v60 = vpop.eup %952 }
 0x29f   : > { %v552_v3 = vpop.xlane.xlu1 %551  ;;  %v588_v6 = vmul.f32 %v953_v60, %v1133_v12 }
 0x2a0   : > { %958 = vrcp.f32 %v552_v3 }
 0x2a1   : > { %v601_v7 = vpack.c.bf16 %v588_v6, %v587_v5 }
 0x2a2   : > { %v955_v9 = vpop.eup %954 }
 0x2a3   : > { %851 = vmatpush3.bf16.xpose.msra.mxu1 %v601_v7  ;;  %v554_v0 = vpop.xlane.xlu0 %553  ;;  %v589_v11 = vmul.f32 %v955_v9, %v1136_v16 }
 0x2a4   : > { %960 = vrcp.f32 %v554_v0  ;;  %852 = vmatprep.subr.bf16.mxu1 %v1014_v29 }
 0x2a6   : > { %v957_v4 = vpop.eup %956 }
 0x2a7   : > { %v556_v10 = vpop.xlane.xlu1 %555  ;;  %v590_v13 = vmul.f32 %v957_v4, %v1140_v21 }
 0x2a8   : > { %962 = vrcp.f32 %v556_v10 }
 0x2a9   : > { %v602_v14 = vpack.c.bf16 %v590_v13, %v589_v11 }
 0x2aa   : > { %v959_v15 = vpop.eup %958 }
 0x2ab   : > { %853 = vmatpush3.bf16.xpose.msra.mxu1 %v602_v14  ;;  %v558_v8 = vpop.xlane.xlu0 %557  ;;  %v591_v19 = vmul.f32 %v959_v15, %v1145_v27 }
 0x2ac   : > { %964 = vrcp.f32 %v558_v8  ;;  %854 = vmatprep.subr.bf16.mxu1 %v1014_v29 }
 0x2ae   : > { %v961_v12 = vpop.eup %960 }
 0x2af   : > { %v560_v17 = vpop.xlane.xlu1 %559  ;;  %v562_v18 = vpop.xlane.xlu0 %561  ;;  %v592_v20 = vmul.f32 %v961_v12, %v1151_v34 }
 0x2b0   : > { %966 = vrcp.f32 %v560_v17 }
 0x2b1   : > { %968 = vrcp.f32 %v562_v18  ;;  %v603_v16 = vpack.c.bf16 %v592_v20, %v591_v19 }
 0x2b2   : > { %v963_v21 = vpop.eup %962 }
 0x2b3   : > { %855 = vmatpush3.bf16.xpose.msra.mxu1 %v603_v16  ;;  %v564_v22 = vpop.xlane.xlu1 %563  ;;  %v566_v23 = vpop.xlane.xlu0 %565  ;;  %v593_v25 = vmul.f32 %v963_v21, %v1155_v40  ;;  %v293_v40 = vld [vmem:[%s278_s30] sm:$0xf] }
 0x2b4   : > { %856 = vmatprep.subr.bf16.mxu1 %v1014_v29  ;;  %970 = vrcp.f32 %v564_v22 }
 0x2b5   : > { %972 = vrcp.f32 %v566_v23 }
 0x2b6   : > { %v965_v24 = vpop.eup %964 }
 0x2b7   : > { %v594_v26 = vmul.f32 %v965_v24, %v1158_v41 }
 0x2b9   : > { %v604_v28 = vpack.c.bf16 %v594_v26, %v593_v25 }
 0x2ba   : > { %v967_v27 = vpop.eup %966 }
 0x2bb   : > { %v969_v30 = vpop.eup %968  ;;  %857 = vmatpush3.bf16.xpose.msra.mxu1 %v604_v28  ;;  %v595_v31 = vmul.f32 %v967_v27, %v1163_v43 }
 0x2bc   : > { %858 = vmatprep.subr.bf16.mxu1 %v1014_v29  ;;  %v596_v32 = vmul.f32 %v969_v30, %v1161_v42 }
 0x2be   : > { %v971_v33 = vpop.eup %970  ;;  %v605_v34 = vpack.c.bf16 %v596_v32, %v595_v31 }
 0x2bf   : > { %v973_v35 = vpop.eup %972  ;;  %v597_v36 = vmul.f32 %v971_v33, %v1169_v45 }
 0x2c0   : > { %v598_v37 = vmul.f32 %v973_v35, %v1167_v44 }
 0x2c2   : > { %v606_v38 = vpack.c.bf16 %v598_v37, %v597_v36 }
 0x2c3   : > { %859 = vmatpush3.bf16.xpose.msra.mxu1 %v605_v34 }
 0x2c4   : > { %860 = vmatprep.subr.bf16.mxu1 %v1014_v29 }
 0x2cb   : > { %861 = vmatpush3.bf16.xpose.msra.mxu1 %v606_v38 }
 0x2d2   : > { %863 = vmatmul.mubr.bf16.vlgmr.msra.gmra.mrb[0].mxu1 %v293_v40 }
 0x3a5   : > { %v641_v39 = vpop.f32.mrb[0].mxu1 }
 0x3a6   : > { %v647_v41 = vpack.c.bf16 %v641_v39, %v641_v39  ;;  %v864_v42 = vpop.f32.mrb[1].mxu1 }
 0x3a7   : > { %v644_v29 = vpop.f32.mrb[2].mxu1 }
 0x3a8   : > { %648 = vst [vmem:[%s289_s6] sm:$0xf] %v647_v41  ;;  %v865_v43 = vpop.f32.mrb[3].mxu1 }
 0x3a9 PF: > { %s13_s16 = sadd.s32 1, %s1012_s16   ;;  %s1224_s12 = smov %s1004_s14 }
 0x3aa   : > { %p10_p7 = scmp.ge.s32.totalorder %s13_s16, 10   ;;  %s1225_s13 = smov %s1008_s15 }
 0x3ab   : > { %s1226_s14 = smov %s1229_s17  ;;  %s1227_s15 = smov %s1233_s18 }
 0x3ac   :  { %12 = sbr.rel (!%p10_p7) target bundleno = 3 (0x3), region = 68 }

// kernel: multi_headed_attention.3
= control target key start
LH: loop header
LB: loop body
LE: loop exit
PB: predicated region body
PF: predicated region fallthrough
CT: control target
= control target key end

     0   :  { %s1233_s24 = smov 0   ;;  %s1235_s25 = smov 0   ;;  %s1347_s0 = inlined_call_operand.vmem [shape: f32[2,32,128], index: 0, kind: input, shape index: {}]   ;;  %s1348_s1 = inlined_call_operand.vmem [shape: f32[2,32,128], index: 1, kind: input, shape index: {}]   ;;  %s1349_s2 = inlined_call_operand.vmem [shape: f32[2,32,128], index: 2, kind: input, shape index: {}]   ;;  %s1350_s3 = inlined_call_operand.vmem [shape: bf16[3,32,32], index: 3, kind: input, shape index: {}]   ;;  %s1351_s4 = inlined_call_operand.vmem [shape: f32[3,32,1], index: 4, kind: input, shape index: {}]   ;;  %s1352_s5 = inlined_call_operand.vmem [shape: bf16[2,32,128], index: 5, kind: output, shape index: {0}]   ;;  %s1353_s6 = inlined_call_operand.vmem [shape: bf16[2,32,128], index: 6, kind: output, shape index: {1}]   ;;  %s1354_s7 = inlined_call_operand.vmem [shape: bf16[2,32,128], index: 7, kind: output, shape index: {2}]  }
   0x1   :  { %s1237_s26 = smov 0  }
   0x2 LB: > { %s30_s27 = sadd.s32 1, %s1186_s25  ;;  %p993_p0 = scmp.ge.s32.totalorder %s1190_s26, 1  ;;  %s1190_s26 = sphi %s1237_s26, %s18_s26   ;;  %s1186_s25 = sphi %s1235_s25, %s1356_s25   ;;  %s1182_s24 = sphi %s1233_s24, %s1355_s24  }
   0x3   : > { %p32_p1 = scmp.ge.s32.totalorder %s30_s27, 2  ;;  %p295_p2 = scmp.lt.s32.totalorder %s1190_s26, 3 }
   0x5   : > { %s1358_s27 = smov (%p32_p1, %s30_s27), 0  ;;  %p296_p3 = pnand %p993_p0, %p295_p2 }
   0x6   : > { %p365_p4 = scmp.lt.s32.totalorder (!%p296_p3), %s1182_s24, 1  ;;  %v1162_v0 = vld [vmem:[%s1350_s3] sm:$0xff] (!%p296_p3)   ;;  %vm458_vm0 = vcmask (!%p296_p3), 261120   ;;  %v1163_v1 = vld [vmem:[%s1350_s3 + $0x10] sm:$0xff] (!%p296_p3)   ;;  %v1192_v2 = vmov (!%p296_p3), 0   ;;  %v1164_v22 = vld [vmem:[%s1350_s3 + $0x8] sm:$0xff] (!%p296_p3)  }
   0x7   : > { %299 = sbr.rel (%p296_p3) target bundleno = 256 (0x100), region = 40  ;;  %1115 = vmatprep.mubr.msk.bf16.mxu0 (!%p296_p3), %vm458_vm0, %v1162_v0  ;;  %1123 = vmatprep.mubr.msk.bf16.mxu1 (!%p296_p3), %vm458_vm0, %v1163_v1  ;;  %v426_v17 = vld [vmem:[%s1351_s4 + $0x10] sm:$0xff] (!%p296_p3)  ;;  %v424_v18 = vld [vmem:[%s1351_s4] sm:$0xff] (!%p296_p3)  ;;  %v427_v23 = vld [vmem:[%s1351_s4 + $0x18] sm:$0xff] (!%p296_p3) }
   0x8   : > { %1161 = vset.pattern.permute.xlu1 (!%p296_p3), %v1192_v2  ;;  %1160 = vset.pattern.permute.xlu0 (!%p296_p3), %v1192_v2  ;;  %v1165_v24 = vld [vmem:[%s1350_s3 + $0x18] sm:$0xff] (!%p296_p3)   ;;  %v425_v25 = vld [vmem:[%s1351_s4 + $0x8] sm:$0xff] (!%p296_p3)  ;;  %v1166_v27 = vld [vmem:[%s1350_s3 + $0x20] sm:$0xff] (!%p296_p3)  }
   0x9   : > { %440 = vperm.xlu1 (!%p296_p3), %1161, %v426_v17   ;;  %430 = vperm.xlu0 (!%p296_p3), %1160, %v424_v18   ;;  %v1019_v28 = vld [vmem:[%s1351_s4 + $0x28] sm:$0xff] (!%p296_p3)  ;;  %v1018_v29 = vld [vmem:[%s1351_s4 + $0x20] sm:$0xff] (!%p296_p3)  ;;  %v1021_v31 = vld [vmem:[%s1351_s4 + $0x38] sm:$0xff] (!%p296_p3) }
   0xa   : > { %v1167_v30 = vld [vmem:[%s1350_s3 + $0x28] sm:$0xff] (!%p296_p3)   ;;  %v1020_v32 = vld [vmem:[%s1351_s4 + $0x30] sm:$0xff] (!%p296_p3)  ;;  %v1034_v34 = vld [vmem:[%s1351_s4 + $0x40] sm:$0xff] (!%p296_p3) }
   0xb   : > { %v1035_v33 = vld [vmem:[%s1351_s4 + $0x48] sm:$0xff] (!%p296_p3)  ;;  %v1037_v35 = vld [vmem:[%s1351_s4 + $0x58] sm:$0xff] (!%p296_p3)  ;;  %v1036_v36 = vld [vmem:[%s1351_s4 + $0x50] sm:$0xff] (!%p296_p3) }
   0xd   : > { %445 = vperm.xlu1 (!%p296_p3), %1161, %v427_v23   ;;  %435 = vperm.xlu0 (!%p296_p3), %1160, %v425_v25  }
   0xe   : > { %s1360_s24 = smov (!%p365_p4, %s1182_s24), 1 }
   0xf   : > { %s1048_s9 = sshll.u32 %s1360_s24, 5  ;;  %s1324_s13 = sshll.u32 %s1360_s24, 4 }
  0x10   : > { %s372_s12 = scalar_lea.vmem %s1347_s0, %s1048_s9  ;;  %s380_s15 = scalar_lea.vmem %s1348_s1, %s1048_s9 }
  0x11   : > { %v414_v3 = vld [vmem:[%s372_s12] sm:$0xff]  ;;  %v415_v4 = vld [vmem:[%s372_s12 + $0x8] sm:$0xff]  ;;  %s388_s18 = scalar_lea.vmem %s1349_s2, %s1048_s9  ;;  %v416_v8 = vld [vmem:[%s372_s12 + $0x10] sm:$0xff]  ;;  %557 = vperm.xlu1 %1161, %v1019_v28   ;;  %552 = vperm.xlu0 %1160, %v1018_v29   ;;  %s396_s16 = scalar_lea.vmem %s1352_s5, %s1324_s13 }
  0x12   : > { %v534_v5 = vld [vmem:[%s380_s15] sm:$0xff]  ;;  %v418_v6 = vpack.c.bf16 %v415_v4, %v414_v3  ;;  %v535_v7 = vld [vmem:[%s380_s15 + $0x8] sm:$0xff]  ;;  %v417_v9 = vld [vmem:[%s372_s12 + $0x18] sm:$0xff]  ;;  %s412_s21 = scalar_lea.vmem %s1354_s7, %s1324_s13 }
  0x13   : > { %v538_v10 = vpack.c.bf16 %v535_v7, %v534_v5  ;;  %v419_v11 = vpack.c.bf16 %v417_v9, %v416_v8  ;;  %v536_v12 = vld [vmem:[%s380_s15 + $0x10] sm:$0xff]  ;;  %v537_v13 = vld [vmem:[%s380_s15 + $0x18] sm:$0xff]  ;;  %v655_v14 = vld [vmem:[%s388_s18] sm:$0xff] }
  0x14   : > { %1111 = vmatprep.subr.bf16.mxu0 %v418_v6  ;;  %v539_v15 = vpack.c.bf16 %v537_v13, %v536_v12  ;;  %v656_v16 = vld [vmem:[%s388_s18 + $0x8] sm:$0xff]  ;;  %v657_v20 = vld [vmem:[%s388_s18 + $0x10] sm:$0xff]  ;;  %v658_v21 = vld [vmem:[%s388_s18 + $0x18] sm:$0xff]  ;;  %s404_s18 = scalar_lea.vmem %s1353_s6, %s1324_s13 }
  0x15   : > { %1119 = vmatprep.subr.bf16.mxu1 %v538_v10  ;;  %1112 = vmatpush3.bf16.msra.mxu0 %v418_v6  ;;  %v659_v19 = vpack.c.bf16 %v656_v16, %v655_v14  ;;  %v660_v26 = vpack.c.bf16 %v658_v21, %v657_v20 }
  0x16   : > { %1120 = vmatpush3.bf16.msra.mxu1 %v538_v10  ;;  %1113 = vmatprep.subr.bf16.mxu0 %v419_v11 }
  0x17   : > { %1121 = vmatprep.subr.bf16.mxu1 %v539_v15  ;;  %567 = vperm.xlu1 %1161, %v1021_v31  }
  0x18   : > { %562 = vperm.xlu0 %1160, %v1020_v32  }
  0x19   : > { %1114 = vmatpush3.bf16.msra.mxu0 %v419_v11 }
  0x1a   : > { %1122 = vmatpush3.bf16.msra.mxu1 %v539_v15  ;;  %1127 = vmatprep.subr.bf16.mxu0 %v659_v19 }
  0x1b   : > { %678 = vperm.xlu1 %1161, %v1035_v33  }
  0x1c   : > { %1116 = vmatmul.mubr.msk.bf16.vlgmr.msra.gmra.mrb[0].mxu0 %vm458_vm0, %v1164_v22  ;;  %673 = vperm.xlu0 %1160, %v1034_v34  }
  0x1d   : > { %1124 = vmatmul.mubr.msk.bf16.vlgmr.msra.gmra.mrb[0].mxu1 %vm458_vm0, %v1165_v24  ;;  %1128 = vmatpush3.bf16.msra.mxu0 %v659_v19 }
  0x1e   : > { %1129 = vmatprep.subr.bf16.mxu0 %v660_v26  ;;  %1131 = vmatprep.mubr.msk.bf16.mxu0 %vm458_vm0, %v1166_v27 }
  0x1f   : > { %688 = vperm.xlu1 %1161, %v1037_v35  }
  0x20   : > { %683 = vperm.xlu0 %1160, %v1036_v36  }
  0x21   : > { %1130 = vmatpush3.bf16.msra.mxu0 %v660_v26 }
  0x24   : > { %1132 = vmatmul.mubr.msk.bf16.vlgmr.msra.gmra.mrb[4].mxu0 %vm458_vm0, %v1167_v30 }
  0x88   : > { %v441_v37 = vpop.permute.xlu1 %440  ;;  %v431_v38 = vpop.permute.xlu0 %430 }
  0x8c   : > { %v446_v39 = vpop.permute.xlu1 %445  ;;  %v436_v40 = vpop.permute.xlu0 %435 }
  0x90   : > { %v558_v41 = vpop.permute.xlu1 %557  ;;  %v553_v42 = vpop.permute.xlu0 %552 }
  0x96   : > { %v568_v43 = vpop.permute.xlu1 %567 }
  0x97   : > { %v563_v44 = vpop.permute.xlu0 %562 }
  0x9a   : > { %v679_v45 = vpop.permute.xlu1 %678 }
  0x9b   : > { %v674_v55 = vpop.permute.xlu0 %673 }
  0x9e   : > { %v689_v4 = vpop.permute.xlu1 %688 }
  0x9f   : > { %v684_v6 = vpop.permute.xlu0 %683 }
  0xef   : > { %v1117_v46 = vpop.f32.mrb[0].mxu0 }
  0xf0   : > { %v1125_v47 = vpop.f32.mrb[0].mxu1  ;;  %v499_v48 = vpop.f32.mrb[1].mxu0  ;;  %v508_v51 = vadd.f32 %v1117_v46, %v441_v37 }
  0xf1   : > { %v620_v49 = vpop.f32.mrb[1].mxu1  ;;  %v1118_v50 = vpop.f32.mrb[2].mxu0  ;;  %v629_v56 = vadd.f32 %v1125_v47, %v563_v44  ;;  %v500_v57 = vadd.f32 %v499_v48, %v431_v38 }
  0xf2   : > { %v511_v52 = vadd.f32 %v1118_v50, %v446_v39  ;;  %v1126_v53 = vpop.f32.mrb[2].mxu1  ;;  %v502_v54 = vpop.f32.mrb[3].mxu0  ;;  %v621_v61 = vadd.f32 %v620_v49, %v553_v42 }
  0xf3   : > { %v632_v58 = vadd.f32 %v1126_v53, %v568_v43  ;;  %v503_v59 = vadd.f32 %v502_v54, %v436_v40  ;;  %v623_v60 = vpop.f32.mrb[3].mxu1 }
  0xf4   : > { %v1074_v62 = vpack.c.bf16 %v511_v52, %v508_v51  ;;  %v624_v63 = vadd.f32 %v623_v60, %v558_v41 }
  0xf5   : > { %v1084_v0 = vpack.c.bf16 %v632_v58, %v629_v56  ;;  %v1069_v1 = vpack.c.bf16 %v503_v59, %v500_v57 }
  0xf6   : > { %1096 = vst [vmem:[%s396_s16 + $0x8] sm:$0xff] %v1074_v62   ;;  %v1079_v2 = vpack.c.bf16 %v624_v63, %v621_v61 }
  0xf7   : > { %1097 = vst [vmem:[%s404_s18 + $0x8] sm:$0xff] %v1084_v0   ;;  %1070 = vst [vmem:[%s396_s16] sm:$0xff] %v1069_v1   ;;  %v1133_v3 = vpop.f32.mrb[4].mxu0 }
  0xf8   : > { %1080 = vst [vmem:[%s404_s18] sm:$0xff] %v1079_v2   ;;  %v741_v5 = vpop.f32.mrb[5].mxu0  ;;  %v750_v8 = vadd.f32 %v1133_v3, %v684_v6 }
  0xf9   : > { %v1134_v7 = vpop.f32.mrb[6].mxu0  ;;  %v742_v11 = vadd.f32 %v741_v5, %v674_v55 }
  0xfa   : > { %v753_v9 = vadd.f32 %v1134_v7, %v689_v4  ;;  %v744_v10 = vpop.f32.mrb[7].mxu0 }
  0xfb   : > { %v745_v12 = vadd.f32 %v744_v10, %v679_v45 }
  0xfc   : > { %v1094_v13 = vpack.c.bf16 %v753_v9, %v750_v8 }
  0xfd   : > { %v1089_v14 = vpack.c.bf16 %v745_v12, %v742_v11 }
  0xfe   : > { %1098 = vst [vmem:[%s412_s21 + $0x8] sm:$0xff] %v1094_v13  }
  0xff   : > { %1090 = vst [vmem:[%s412_s21] sm:$0xff] %v1089_v14  }
 0x100 PF: > { %s18_s26 = sadd.s32 1, %s1190_s26   ;;  %s1355_s24 = smov %s1186_s25 }
 0x101   : > { %p15_p5 = scmp.ge.s32.totalorder %s18_s26, 4   ;;  %s1356_s25 = smov %s1358_s27 }
 0x103   :  { %17 = sbr.rel (!%p15_p5) target bundleno = 2 (0x2), region = 104 }

</bundles_post_ra>
